<compile_context>
chip_gen: v6e
topology: v6e:2x2x1
jax: 0.10.0
libtpu: 0.0.40
codegen_flags: <defaults>
</compile_context>

<pallas_src>
import functools

import jax
import jax.numpy as jnp
from jax.experimental import pallas as pl
from jax.experimental.pallas import tpu as pltpu

_LANE = 128      # lane width (last dim alignment)
_SUBLANE = 8     # f32 sublane multiple


def _round_up(x, m):
    return (x + m - 1) // m * m


# ------------------------------ Pallas kernel ------------------------------ #

def _decoder_step_kernel(ids_ref, emb_ref, h_ref, c_ref, w_ref, b_ref,
                         fcw_ref, fcb_ref,
                         pred_ref, h_out_ref, c_out_ref):
    """One full decoder step, fully fused.

    ids_ref : [Bp, 1]            int32 token ids (padded batch)
    emb_ref : [Vp, INp]          padded embedding table
    h_ref   : [L, Bp, Hp]        hidden state (aliased with h_out_ref)
    c_ref   : [L, Bp, Hp]        cell state   (aliased with c_out_ref)
    w_ref   : [L, INp+Hp, 4*Hp]  per-layer [W_ih^T ; W_hh^T], gate-padded cols
    b_ref   : [L, 1, 4*Hp]       per-layer b_ih + b_hh, gate-padded
    fcw_ref : [Hp, Vp]           fc_out weight^T, padded
    fcb_ref : [1, Vp]            fc_out bias, padded
    pred_ref: [Bp, Vp]
    """
    n_layers, Bp, Hp = h_ref.shape
    Vp = emb_ref.shape[0]
    INp = w_ref.shape[1] - Hp

    # --- embedding gather as a lane-dense one-hot matmul on the MXU ---
    ids = ids_ref[...]                                             # [Bp, 1]
    iota = jax.lax.broadcasted_iota(jnp.int32, (Bp, Vp), 1)
    onehot = (iota == ids).astype(jnp.float32)                     # [Bp, Vp]
    x = jnp.dot(onehot, emb_ref[...],
                preferred_element_type=jnp.float32)                # [Bp, INp]
    # dropout(embedded) is eval-mode -> identity

    h_last = x[:, :Hp]
    for layer in range(n_layers):                                  # static unroll
        h = h_ref[layer]                                           # [Bp, Hp]
        c = c_ref[layer]
        xh = jnp.concatenate([x, h], axis=-1)                      # [Bp, INp+Hp]
        gates = (jnp.dot(xh, w_ref[layer],
                         preferred_element_type=jnp.float32)
                 + b_ref[layer])                                   # [Bp, 4*Hp]

        # lane-aligned gate slices (Hp is a multiple of 128)
        i = jax.nn.sigmoid(gates[:, 0 * Hp:1 * Hp])
        f = jax.nn.sigmoid(gates[:, 1 * Hp:2 * Hp])
        g = jnp.tanh(gates[:, 2 * Hp:3 * Hp])
        o = jax.nn.sigmoid(gates[:, 3 * Hp:4 * Hp])

        c_new = f * c + i * g
        h_new = o * jnp.tanh(c_new)

        h_out_ref[layer] = h_new
        c_out_ref[layer] = c_new

        h_last = h_new
        x = h_new
        if INp > Hp:                                               # trace-time pad
            x = jnp.pad(h_new, ((0, 0), (0, INp - Hp)))
        # nn.LSTM inter-layer dropout is train-only; eval -> identity

    # --- fc_out head: lane-dense [Bp, Vp] output ---
    pred_ref[...] = (jnp.dot(h_last, fcw_ref[...],
                             preferred_element_type=jnp.float32)
                     + fcb_ref[...])


_VMEM = pl.BlockSpec(memory_space=pltpu.MemorySpace.VMEM)


def _decoder_step(ids_p, packed, h_p, c_p):
    n_layers, Bp, Hp = h_p.shape
    Vp = packed["fcb"].shape[-1]
    return pl.pallas_call(
        _decoder_step_kernel,
        out_shape=(jax.ShapeDtypeStruct((Bp, Vp), jnp.float32),
                   jax.ShapeDtypeStruct((n_layers, Bp, Hp), jnp.float32),
                   jax.ShapeDtypeStruct((n_layers, Bp, Hp), jnp.float32)),
        in_specs=[_VMEM] * 8,
        out_specs=(_VMEM, _VMEM, _VMEM),
        # hidden / cell updated in place (each layer reads its own state
        # before writing it back, so aliasing is safe).
        input_output_aliases={2: 1, 3: 2},
    )(ids_p, packed["emb"], h_p, c_p, packed["w"], packed["b"],
      packed["fcw"], packed["fcb"])


# ----------------------------- parameter handling --------------------------- #

def init_decoder_params(key, output_dim, emb_dim, hid_dim, n_layers):
    """Logical (torch-shaped) parameters; used by the pure-JAX reference."""
    keys = jax.random.split(key, 3 + 4 * n_layers)
    k = iter(keys)
    bound = 1.0 / float(hid_dim) ** 0.5

    params = {
        "embedding": jax.random.normal(next(k), (output_dim, emb_dim),
                                       jnp.float32) * 0.1,
        "fc_w": jax.random.uniform(next(k), (output_dim, hid_dim),
                                   jnp.float32, -bound, bound),
        "fc_b": jax.random.uniform(next(k), (output_dim,),
                                   jnp.float32, -bound, bound),
        "layers": [],
    }
    for layer in range(n_layers):
        in_dim = emb_dim if layer == 0 else hid_dim
        params["layers"].append({
            "w_ih": jax.random.uniform(next(k), (4 * hid_dim, in_dim),
                                       jnp.float32, -bound, bound),
            "w_hh": jax.random.uniform(next(k), (4 * hid_dim, hid_dim),
                                       jnp.float32, -bound, bound),
            "b_ih": jax.random.uniform(next(k), (4 * hid_dim,),
                                       jnp.float32, -bound, bound),
            "b_hh": jax.random.uniform(next(k), (4 * hid_dim,),
                                       jnp.float32, -bound, bound),
        })
    return params


def pack_decoder_params(params, output_dim, emb_dim, hid_dim, n_layers):
    """Pad + stack logical params into the lane-aligned kernel layout."""
    Vp = _round_up(output_dim, _LANE)
    Hp = _round_up(hid_dim, _LANE)
    INp = _round_up(max(emb_dim, hid_dim), _LANE)

    emb_p = jnp.zeros((Vp, INp), jnp.float32)
    emb_p = emb_p.at[:output_dim, :emb_dim].set(params["embedding"])

    w_p = jnp.zeros((n_layers, INp + Hp, 4 * Hp), jnp.float32)
    b_p = jnp.zeros((n_layers, 1, 4 * Hp), jnp.float32)
    for layer in range(n_layers):
        lp = params["layers"][layer]
        in_dim = lp["w_ih"].shape[1]
        w_ih_t = lp["w_ih"].T                      # [in_dim, 4H]
        w_hh_t = lp["w_hh"].T                      # [H, 4H]
        bias = lp["b_ih"] + lp["b_hh"]             # [4H]
        for g in range(4):                         # gate order i, f, g, o
            w_p = w_p.at[layer, :in_dim, g * Hp:g * Hp + hid_dim].set(
                w_ih_t[:, g * hid_dim:(g + 1) * hid_dim])
            w_p = w_p.at[layer, INp:INp + hid_dim, g * Hp:g * Hp + hid_dim].set(
                w_hh_t[:, g * hid_dim:(g + 1) * hid_dim])
            b_p = b_p.at[layer, 0, g * Hp:g * Hp + hid_dim].set(
                bias[g * hid_dim:(g + 1) * hid_dim])

    fcw_p = jnp.zeros((Hp, Vp), jnp.float32)
    fcw_p = fcw_p.at[:hid_dim, :output_dim].set(params["fc_w"].T)
    fcb_p = jnp.zeros((1, Vp), jnp.float32)
    fcb_p = fcb_p.at[0, :output_dim].set(params["fc_b"])

    return {"emb": emb_p, "w": w_p, "b": b_p, "fcw": fcw_p, "fcb": fcb_p}


# ------------------------------ forward wrappers ---------------------------- #

@functools.partial(jax.jit, static_argnames=("output_dim",))
def decoder_forward(packed, input_ids, hidden, cell, *, output_dim):
    """Equivalent of Decoder.forward(input, hidden, cell) in eval mode.

    input_ids : [B] int32, hidden/cell : [n_layers, B, hid_dim]
    returns (prediction [B, output_dim], hidden, cell)
    """
    n_layers, B, H = hidden.shape
    Hp = packed["w"].shape[2] // 4
    Bp = _round_up(max(B, _SUBLANE), _SUBLANE)

    ids_p = jnp.zeros((Bp, 1), jnp.int32).at[:B, 0].set(
        input_ids.astype(jnp.int32))
    h_p = jnp.zeros((n_layers, Bp, Hp), jnp.float32).at[:, :B, :H].set(hidden)
    c_p = jnp.zeros((n_layers, Bp, Hp), jnp.float32).at[:, :B, :H].set(cell)

    pred_p, h_new_p, c_new_p = _decoder_step(ids_p, packed, h_p, c_p)

    return (pred_p[:B, :output_dim],
            h_new_p[:, :B, :H],
            c_new_p[:, :B, :H])


def decoder_forward_ref(params, input_ids, hidden, cell):
    """Pure-JAX reference (mirrors torch.nn.LSTM semantics, eval mode)."""
    x = jnp.take(params["embedding"], input_ids, axis=0)
    H = hidden.shape[-1]
    new_h, new_c = [], []
    hi = jax.lax.Precision.HIGHEST
    for layer in range(hidden.shape[0]):
        lp = params["layers"][layer]
        gates = (jnp.dot(x, lp["w_ih"].T, precision=hi)
                 + jnp.dot(hidden[layer], lp["w_hh"].T, precision=hi)
                 + (lp["b_ih"] + lp["b_hh"])[None, :])
        i = jax.nn.sigmoid(gates[:, 0 * H:1 * H])
        f = jax.nn.sigmoid(gates[:, 1 * H:2 * H])
        g = jnp.tanh(gates[:, 2 * H:3 * H])
        o = jax.nn.sigmoid(gates[:, 3 * H:4 * H])
        c_l = f * cell[layer] + i * g
        h_l = o * jnp.tanh(c_l)
        new_h.append(h_l)
        new_c.append(c_l)
        x = h_l
    pred = jnp.dot(x, params["fc_w"].T, precision=hi) + params["fc_b"][None, :]
    return pred, jnp.stack(new_h, 0), jnp.stack(new_c, 0)


# ----------------------------------- main ----------------------------------- #

if __name__ == "__main__":
    OUTPUT_DIM = 64    # target vocab size
    EMB_DIM = 32
    HID_DIM = 32
    N_LAYERS = 2
    BATCH = 2

    key = jax.random.PRNGKey(0)
    k_params, k_in, k_h, k_c = jax.random.split(key, 4)

    params = init_decoder_params(k_params, OUTPUT_DIM, EMB_DIM, HID_DIM, N_LAYERS)
    packed = pack_decoder_params(params, OUTPUT_DIM, EMB_DIM, HID_DIM, N_LAYERS)

    input_ids = jax.random.randint(k_in, (BATCH,), 0, OUTPUT_DIM, jnp.int32)
    hidden = jax.random.normal(k_h, (N_LAYERS, BATCH, HID_DIM), jnp.float32)
    cell = jax.random.normal(k_c, (N_LAYERS, BATCH, HID_DIM), jnp.float32)

    pred, h_new, c_new = decoder_forward(packed, input_ids, hidden, cell,
                                         output_dim=OUTPUT_DIM)
    jax.block_until_ready((pred, h_new, c_new))

    pred_r, h_r, c_r = decoder_forward_ref(params, input_ids, hidden, cell)

    assert pred.shape == (BATCH, OUTPUT_DIM)
    assert h_new.shape == (N_LAYERS, BATCH, HID_DIM)
    assert c_new.shape == (N_LAYERS, BATCH, HID_DIM)
    assert jnp.allclose(pred, pred_r, atol=1e-4, rtol=1e-4)
    assert jnp.allclose(h_new, h_r, atol=1e-4, rtol=1e-4)
    assert jnp.allclose(c_new, c_r, atol=1e-4, rtol=1e-4)

    print("KERNEL_OK")
</pallas_src>

<mosaic_0001>
module attributes {stable_mosaic.version = 11 : i64} {
  func.func @_decoder_step_kernel(%arg0: memref<8x1xi32, #tpu.memory_space<vmem>>, %arg1: memref<128x128xf32, #tpu.memory_space<vmem>>, %arg2: memref<2x8x128xf32, #tpu.memory_space<vmem>>, %arg3: memref<2x8x128xf32, #tpu.memory_space<vmem>>, %arg4: memref<2x256x512xf32, #tpu.memory_space<vmem>>, %arg5: memref<2x1x512xf32, #tpu.memory_space<vmem>>, %arg6: memref<128x128xf32, #tpu.memory_space<vmem>>, %arg7: memref<1x128xf32, #tpu.memory_space<vmem>>, %arg8: memref<8x128xf32, #tpu.memory_space<vmem>>, %arg9: memref<2x8x128xf32, #tpu.memory_space<vmem>>, %arg10: memref<2x8x128xf32, #tpu.memory_space<vmem>>) attributes {dimension_semantics = [], scalar_prefetch = 0 : i64, scratch_operands = 0 : i64, tpu.core_type = #tpu.core_type<tc>} {
    %c0 = arith.constant 0 : index
    %c0_0 = arith.constant 0 : index
    %0 = vector.load %arg0[%c0, %c0_0] : memref<8x1xi32, #tpu.memory_space<vmem>>, vector<8x1xi32>
    %1 = tpu.iota {dimensions = array<i32: 1>} : vector<8x128xi32>
    %2 = vector.broadcast %0 : vector<8x1xi32> to vector<8x128xi32>
    %3 = arith.cmpi eq, %1, %2 : vector<8x128xi32>
    %4 = arith.extui %3 : vector<8x128xi1> to vector<8x128xi32>
    %5 = arith.sitofp %4 : vector<8x128xi32> to vector<8x128xf32>
    %c0_1 = arith.constant 0 : index
    %c0_2 = arith.constant 0 : index
    %6 = vector.load %arg1[%c0_1, %c0_2] : memref<128x128xf32, #tpu.memory_space<vmem>>, vector<128x128xf32>
    %cst = arith.constant dense<0.000000e+00> : vector<8x128xf32>
    %7 = tpu.matmul %5, %6, %cst {dimension_numbers = #tpu.dot_dimension_numbers<[1], [0], [0], [1], [0, 0, 1, 1], [], []>} : vector<8x128xf32>, vector<128x128xf32>, vector<8x128xf32> -> vector<8x128xf32>
    %c0_3 = arith.constant 0 : index
    %c0_4 = arith.constant 0 : index
    %c0_5 = arith.constant 0 : index
    %8 = vector.load %arg2[%c0_3, %c0_4, %c0_5] : memref<2x8x128xf32, #tpu.memory_space<vmem>>, vector<1x8x128xf32>
    %9 = vector.shape_cast %8 : vector<1x8x128xf32> to vector<8x128xf32>
    %c0_6 = arith.constant 0 : index
    %c0_7 = arith.constant 0 : index
    %c0_8 = arith.constant 0 : index
    %10 = vector.load %arg3[%c0_6, %c0_7, %c0_8] : memref<2x8x128xf32, #tpu.memory_space<vmem>>, vector<1x8x128xf32>
    %11 = vector.shape_cast %10 : vector<1x8x128xf32> to vector<8x128xf32>
    %12 = tpu.concatenate %7, %9 in 1 : vector<8x128xf32>, vector<8x128xf32> -> vector<8x256xf32>
    %c0_9 = arith.constant 0 : index
    %c0_10 = arith.constant 0 : index
    %c0_11 = arith.constant 0 : index
    %13 = vector.load %arg4[%c0_9, %c0_10, %c0_11] : memref<2x256x512xf32, #tpu.memory_space<vmem>>, vector<1x256x512xf32>
    %14 = vector.shape_cast %13 : vector<1x256x512xf32> to vector<256x512xf32>
    %cst_12 = arith.constant dense<0.000000e+00> : vector<8x512xf32>
    %15 = tpu.matmul %12, %14, %cst_12 {dimension_numbers = #tpu.dot_dimension_numbers<[1], [0], [0], [1], [0, 0, 1, 1], [], []>} : vector<8x256xf32>, vector<256x512xf32>, vector<8x512xf32> -> vector<8x512xf32>
    %c0_13 = arith.constant 0 : index
    %c0_14 = arith.constant 0 : index
    %c0_15 = arith.constant 0 : index
    %16 = vector.load %arg5[%c0_13, %c0_14, %c0_15] : memref<2x1x512xf32, #tpu.memory_space<vmem>>, vector<1x1x512xf32>
    %17 = vector.shape_cast %16 : vector<1x1x512xf32> to vector<1x512xf32>
    %18 = vector.broadcast %17 : vector<1x512xf32> to vector<8x512xf32>
    %19 = arith.addf %15, %18 : vector<8x512xf32>
    %20 = vector.extract_strided_slice %19 {offsets = [0, 0], sizes = [8, 128], strides = [1, 1]} : vector<8x512xf32> to vector<8x128xf32>
    %21 = arith.negf %20 : vector<8x128xf32>
    %22 = math.exp %21 : vector<8x128xf32>
    %cst_16 = arith.constant 1.000000e+00 : f32
    %23 = vector.broadcast %cst_16 : f32 to vector<8x128xf32>
    %24 = arith.addf %23, %22 : vector<8x128xf32>
    %25 = arith.divf %23, %24 : vector<8x128xf32>
    %26 = vector.extract_strided_slice %19 {offsets = [0, 128], sizes = [8, 128], strides = [1, 1]} : vector<8x512xf32> to vector<8x128xf32>
    %27 = arith.negf %26 : vector<8x128xf32>
    %28 = math.exp %27 : vector<8x128xf32>
    %cst_17 = arith.constant 1.000000e+00 : f32
    %29 = vector.broadcast %cst_17 : f32 to vector<8x128xf32>
    %30 = arith.addf %29, %28 : vector<8x128xf32>
    %31 = arith.divf %29, %30 : vector<8x128xf32>
    %32 = vector.extract_strided_slice %19 {offsets = [0, 256], sizes = [8, 128], strides = [1, 1]} : vector<8x512xf32> to vector<8x128xf32>
    %33 = math.tanh %32 : vector<8x128xf32>
    %34 = vector.extract_strided_slice %19 {offsets = [0, 384], sizes = [8, 128], strides = [1, 1]} : vector<8x512xf32> to vector<8x128xf32>
    %35 = arith.negf %34 : vector<8x128xf32>
    %36 = math.exp %35 : vector<8x128xf32>
    %cst_18 = arith.constant 1.000000e+00 : f32
    %37 = vector.broadcast %cst_18 : f32 to vector<8x128xf32>
    %38 = arith.addf %37, %36 : vector<8x128xf32>
    %39 = arith.divf %37, %38 : vector<8x128xf32>
    %40 = arith.mulf %31, %11 : vector<8x128xf32>
    %41 = arith.mulf %25, %33 : vector<8x128xf32>
    %42 = arith.addf %40, %41 : vector<8x128xf32>
    %43 = math.tanh %42 : vector<8x128xf32>
    %44 = arith.mulf %39, %43 : vector<8x128xf32>
    %c0_19 = arith.constant 0 : index
    %c0_20 = arith.constant 0 : index
    %c0_21 = arith.constant 0 : index
    %45 = vector.load %arg9[%c0_19, %c0_20, %c0_21] : memref<2x8x128xf32, #tpu.memory_space<vmem>>, vector<1x8x128xf32>
    %46 = vector.shape_cast %45 : vector<1x8x128xf32> to vector<8x128xf32>
    %47 = vector.shape_cast %44 : vector<8x128xf32> to vector<1x8x128xf32>
    tpu.vector_store %arg9[%c0_19, %c0_20, %c0_21], %47 {strides = array<i32>} : memref<2x8x128xf32, #tpu.memory_space<vmem>>, vector<1x8x128xf32>,
    %c0_22 = arith.constant 0 : index
    %c0_23 = arith.constant 0 : index
    %c0_24 = arith.constant 0 : index
    %48 = vector.load %arg10[%c0_22, %c0_23, %c0_24] : memref<2x8x128xf32, #tpu.memory_space<vmem>>, vector<1x8x128xf32>
    %49 = vector.shape_cast %48 : vector<1x8x128xf32> to vector<8x128xf32>
    %50 = vector.shape_cast %42 : vector<8x128xf32> to vector<1x8x128xf32>
    tpu.vector_store %arg10[%c0_22, %c0_23, %c0_24], %50 {strides = array<i32>} : memref<2x8x128xf32, #tpu.memory_space<vmem>>, vector<1x8x128xf32>,
    %c1 = arith.constant 1 : index
    %c0_25 = arith.constant 0 : index
    %c0_26 = arith.constant 0 : index
    %51 = vector.load %arg2[%c1, %c0_25, %c0_26] : memref<2x8x128xf32, #tpu.memory_space<vmem>>, vector<1x8x128xf32>
    %52 = vector.shape_cast %51 : vector<1x8x128xf32> to vector<8x128xf32>
    %c1_27 = arith.constant 1 : index
    %c0_28 = arith.constant 0 : index
    %c0_29 = arith.constant 0 : index
    %53 = vector.load %arg3[%c1_27, %c0_28, %c0_29] : memref<2x8x128xf32, #tpu.memory_space<vmem>>, vector<1x8x128xf32>
    %54 = vector.shape_cast %53 : vector<1x8x128xf32> to vector<8x128xf32>
    %55 = tpu.concatenate %44, %52 in 1 : vector<8x128xf32>, vector<8x128xf32> -> vector<8x256xf32>
    %c1_30 = arith.constant 1 : index
    %c0_31 = arith.constant 0 : index
    %c0_32 = arith.constant 0 : index
    %56 = vector.load %arg4[%c1_30, %c0_31, %c0_32] : memref<2x256x512xf32, #tpu.memory_space<vmem>>, vector<1x256x512xf32>
    %57 = vector.shape_cast %56 : vector<1x256x512xf32> to vector<256x512xf32>
    %cst_33 = arith.constant dense<0.000000e+00> : vector<8x512xf32>
    %58 = tpu.matmul %55, %57, %cst_33 {dimension_numbers = #tpu.dot_dimension_numbers<[1], [0], [0], [1], [0, 0, 1, 1], [], []>} : vector<8x256xf32>, vector<256x512xf32>, vector<8x512xf32> -> vector<8x512xf32>
    %c1_34 = arith.constant 1 : index
    %c0_35 = arith.constant 0 : index
    %c0_36 = arith.constant 0 : index
    %59 = vector.load %arg5[%c1_34, %c0_35, %c0_36] : memref<2x1x512xf32, #tpu.memory_space<vmem>>, vector<1x1x512xf32>
    %60 = vector.shape_cast %59 : vector<1x1x512xf32> to vector<1x512xf32>
    %61 = vector.broadcast %60 : vector<1x512xf32> to vector<8x512xf32>
    %62 = arith.addf %58, %61 : vector<8x512xf32>
    %63 = vector.extract_strided_slice %62 {offsets = [0, 0], sizes = [8, 128], strides = [1, 1]} : vector<8x512xf32> to vector<8x128xf32>
    %64 = arith.negf %63 : vector<8x128xf32>
    %65 = math.exp %64 : vector<8x128xf32>
    %cst_37 = arith.constant 1.000000e+00 : f32
    %66 = vector.broadcast %cst_37 : f32 to vector<8x128xf32>
    %67 = arith.addf %66, %65 : vector<8x128xf32>
    %68 = arith.divf %66, %67 : vector<8x128xf32>
    %69 = vector.extract_strided_slice %62 {offsets = [0, 128], sizes = [8, 128], strides = [1, 1]} : vector<8x512xf32> to vector<8x128xf32>
    %70 = arith.negf %69 : vector<8x128xf32>
    %71 = math.exp %70 : vector<8x128xf32>
    %cst_38 = arith.constant 1.000000e+00 : f32
    %72 = vector.broadcast %cst_38 : f32 to vector<8x128xf32>
    %73 = arith.addf %72, %71 : vector<8x128xf32>
    %74 = arith.divf %72, %73 : vector<8x128xf32>
    %75 = vector.extract_strided_slice %62 {offsets = [0, 256], sizes = [8, 128], strides = [1, 1]} : vector<8x512xf32> to vector<8x128xf32>
    %76 = math.tanh %75 : vector<8x128xf32>
    %77 = vector.extract_strided_slice %62 {offsets = [0, 384], sizes = [8, 128], strides = [1, 1]} : vector<8x512xf32> to vector<8x128xf32>
    %78 = arith.negf %77 : vector<8x128xf32>
    %79 = math.exp %78 : vector<8x128xf32>
    %cst_39 = arith.constant 1.000000e+00 : f32
    %80 = vector.broadcast %cst_39 : f32 to vector<8x128xf32>
    %81 = arith.addf %80, %79 : vector<8x128xf32>
    %82 = arith.divf %80, %81 : vector<8x128xf32>
    %83 = arith.mulf %74, %54 : vector<8x128xf32>
    %84 = arith.mulf %68, %76 : vector<8x128xf32>
    %85 = arith.addf %83, %84 : vector<8x128xf32>
    %86 = math.tanh %85 : vector<8x128xf32>
    %87 = arith.mulf %82, %86 : vector<8x128xf32>
    %c1_40 = arith.constant 1 : index
    %c0_41 = arith.constant 0 : index
    %c0_42 = arith.constant 0 : index
    %88 = vector.load %arg9[%c1_40, %c0_41, %c0_42] : memref<2x8x128xf32, #tpu.memory_space<vmem>>, vector<1x8x128xf32>
    %89 = vector.shape_cast %88 : vector<1x8x128xf32> to vector<8x128xf32>
    %90 = vector.shape_cast %87 : vector<8x128xf32> to vector<1x8x128xf32>
    tpu.vector_store %arg9[%c1_40, %c0_41, %c0_42], %90 {strides = array<i32>} : memref<2x8x128xf32, #tpu.memory_space<vmem>>, vector<1x8x128xf32>,
    %c1_43 = arith.constant 1 : index
    %c0_44 = arith.constant 0 : index
    %c0_45 = arith.constant 0 : index
    %91 = vector.load %arg10[%c1_43, %c0_44, %c0_45] : memref<2x8x128xf32, #tpu.memory_space<vmem>>, vector<1x8x128xf32>
    %92 = vector.shape_cast %91 : vector<1x8x128xf32> to vector<8x128xf32>
    %93 = vector.shape_cast %85 : vector<8x128xf32> to vector<1x8x128xf32>
    tpu.vector_store %arg10[%c1_43, %c0_44, %c0_45], %93 {strides = array<i32>} : memref<2x8x128xf32, #tpu.memory_space<vmem>>, vector<1x8x128xf32>,
    %c0_46 = arith.constant 0 : index
    %c0_47 = arith.constant 0 : index
    %94 = vector.load %arg6[%c0_46, %c0_47] : memref<128x128xf32, #tpu.memory_space<vmem>>, vector<128x128xf32>
    %cst_48 = arith.constant dense<0.000000e+00> : vector<8x128xf32>
    %95 = tpu.matmul %87, %94, %cst_48 {dimension_numbers = #tpu.dot_dimension_numbers<[1], [0], [0], [1], [0, 0, 1, 1], [], []>} : vector<8x128xf32>, vector<128x128xf32>, vector<8x128xf32> -> vector<8x128xf32>
    %c0_49 = arith.constant 0 : index
    %c0_50 = arith.constant 0 : index
    %96 = vector.load %arg7[%c0_49, %c0_50] : memref<1x128xf32, #tpu.memory_space<vmem>>, vector<1x128xf32>
    %97 = vector.broadcast %96 : vector<1x128xf32> to vector<8x128xf32>
    %98 = arith.addf %95, %97 : vector<8x128xf32>
    %c0_51 = arith.constant 0 : index
    %c0_52 = arith.constant 0 : index
    %99 = vector.load %arg8[%c0_51, %c0_52] : memref<8x128xf32, #tpu.memory_space<vmem>>, vector<8x128xf32>
    tpu.vector_store %arg8[%c0_51, %c0_52], %98 {strides = array<i32>} : memref<8x128xf32, #tpu.memory_space<vmem>>, vector<8x128xf32>,
    return
  }
}

</mosaic_0001>

<bundles_post_ra>
// kernel: decoder_forward.1
= control target key start
LH: loop header
LB: loop body
LE: loop exit
PB: predicated region body
PF: predicated region fallthrough
CT: control target
= control target key end

     0   :  { %16 = vsyncpa [#allocation3], 0  ;;  %s1322_s0 = inlined_call_operand.vmem [shape: s32[8,1], index: 0, kind: input, shape index: {}]   ;;  %s1323_s1 = inlined_call_operand.hbm [shape: f32[128,128], index: 1, kind: input, shape index: {}]   ;;  %s1324_s2 = inlined_call_operand.vmem [shape: f32[2,8,128], index: 2, kind: input, shape index: {}, may-alias: {2,9}]   ;;  %s1325_s3 = inlined_call_operand.vmem [shape: f32[2,8,128], index: 3, kind: input, shape index: {}, may-alias: {3,10}]   ;;  %s1326_s4 = inlined_call_operand.hbm [shape: f32[2,256,512], index: 4, kind: input, shape index: {}]   ;;  %s1327_s5 = inlined_call_operand.vmem [shape: f32[2,1,512], index: 5, kind: input, shape index: {}]   ;;  %s1328_s6 = inlined_call_operand.hbm [shape: f32[128,128], index: 6, kind: input, shape index: {}]   ;;  %s1329_s7 = inlined_call_operand.vmem [shape: f32[1,128], index: 7, kind: input, shape index: {}]   ;;  %s1330_s8 = inlined_call_operand.vmem [shape: f32[8,128], index: 8, kind: output, shape index: {0}]   ;;  %s1331_s9 = inlined_call_operand.vmem [shape: f32[2,8,128], index: 9, kind: output, shape index: {1}, may-alias: {2,9}]   ;;  %s1332_s10 = inlined_call_operand.vmem [shape: f32[2,8,128], index: 10, kind: output, shape index: {2}, may-alias: {3,10}]  }
   0x1   :  { %17 = vsyncpa [#allocation5], 0  ;;  %s1148_s13 = smov [#allocation4]  }
   0x2   :  { %s41_s14 = sshll.u32 %s1148_s13, 4  ;;  %s42_s14 = int_to_ptr.vmem [resolvable:$true] %s41_s14 }
   0x3   :  { %s1092_s15 = scalar_lea.vmem %s42_s14, 32768  ;;  %p1097_p1 = scmp.lt.s32.totalorder %s42_s14, %s42_s14 }
   0x4   :  { %p1093_p0 = scmp.ne.s32.totalorder %s42_s14, %s1092_s15  ;;  %p1098_p2 = scmp.lt.s32.totalorder %s1092_s15, %s1092_s15 }
   0x6   :  { %p1099_p3 = por %p1098_p2, %p1097_p1 }
   0x8   :  { %p1100_p4 = pnand %p1099_p3, %p1093_p0 }
   0xa   :  { %1103 = shalt.err (!%p1100_p4)
}
   0xb   :  { %s1149_s16 = smov 512   ;;  %s1150_s17 = smov 32  }
   0xc   :  { %47 = dma.hbm_to_vmem [thread:$0]  %s1326_s4, 32768, %s42_s14, [#allocation5], %s1149_s16, %s1149_s16, %s1150_s17  }
   0xd   :  { %s1151_s20 = smov [#allocation2]  }
   0xe   :  { %s25_s21 = sshll.u32 %s1151_s20, 4  ;;  %s26_s21 = int_to_ptr.vmem [resolvable:$true] %s25_s21 }
   0xf   :  { %s1112_s22 = scalar_lea.vmem %s26_s21, 2048  ;;  %p1117_p6 = scmp.lt.s32.totalorder %s26_s21, %s26_s21 }
  0x10   :  { %p1113_p5 = scmp.ne.s32.totalorder %s26_s21, %s1112_s22  ;;  %p1118_p7 = scmp.lt.s32.totalorder %s1112_s22, %s1112_s22 }
  0x12   :  { %p1119_p8 = por %p1118_p7, %p1117_p6 }
  0x14   :  { %p1120_p9 = pnand %p1119_p8, %p1113_p5 }
  0x16   :  { %1123 = shalt.err (!%p1120_p9)
}
  0x17   :  { %s1152_s23 = smov 128   ;;  %s1153_s24 = smov 8  }
  0x18   :  { %31 = dma.hbm_to_vmem [thread:$0]  %s1323_s1, 2048, %s26_s21, [#allocation3], %s1152_s23, %s1152_s23, %s1153_s24  }
  0x19   :  { %s1154_s27 = smov [#allocation6]  }
  0x1a   :  { %s55_s28 = sshll.u32 %s1154_s27, 4  ;;  %s56_s28 = int_to_ptr.vmem [resolvable:$true] %s55_s28 }
  0x1b   :  { %s1132_s4 = scalar_lea.vmem %s56_s28, 2048  ;;  %p1137_p11 = scmp.lt.s32.totalorder %s56_s28, %s56_s28 }
  0x1c   :  { %p1133_p10 = scmp.ne.s32.totalorder %s56_s28, %s1132_s4  ;;  %p1138_p12 = scmp.lt.s32.totalorder %s1132_s4, %s1132_s4 }
  0x1e   :  { %p1139_p13 = por %p1138_p12, %p1137_p11 }
  0x20   :  { %p1140_p0 = pnand %p1139_p13, %p1133_p10 }
  0x22   :  { %1143 = shalt.err (!%p1140_p0)
}
  0x23   :  { %61 = dma.hbm_to_vmem [thread:$0]  %s1328_s6, 2048, %s56_s28, [#allocation5], %s1152_s23, %s1152_s23, %s1153_s24  }
  0x24   :  { %1144 = dma.done.wait [#allocation3], 2048  }
  0x25   :  { %1145 = vsyncadd [#allocation3], 4294965248 }
  0x26   :  { %1146 = dma.done.wait [#allocation5], 34816  }
  0x27   :  { %1147 = vsyncadd [#allocation5], 4294932480  ;;  %v1155_v0 = vmov 0   ;;  %v1156_v1 = vmov 0.0   ;;  %vm1157_vm0 = vmmov 0   ;;  %v73_v2 = vld [vmem:[%s1322_s0] sm:$0xff] }
  0x28   :  { %1051 = vset.pattern.permute.xlu0 %v1155_v0  ;;  %970 = vmatprep.subr.mxu0 %v1156_v1  ;;  %v97_v3 = vld [vmem:[#allocation2 + $0x78] sm:$0xff]  ;;  %v96_v4 = vld [vmem:[#allocation2 + $0x70] sm:$0xff]  ;;  %v95_v5 = vld [vmem:[#allocation2 + $0x68] sm:$0xff] }
  0x29   :  { %1002 = vmatprep.mubr.msk.f32.mxu0 %vm1157_vm0, %v1156_v1  ;;  %77 = vperm.xlu0 %1051, %v73_v2   ;;  %v94_v6 = vld [vmem:[#allocation2 + $0x60] sm:$0xff]  ;;  %v231_v7 = vld [vmem:[#allocation4 + $0x1e8] sm:$0xff]  ;;  %v93_v8 = vld [vmem:[#allocation2 + $0x58] sm:$0xff] }
  0x2a   :  { %971 = vmatpush3.msra.mxu0 %v97_v3  ;;  %320 = vmatprep.subr.mxu1 %v231_v7  ;;  %v230_v9 = vld [vmem:[#allocation4 + $0x1e0] sm:$0xff]  ;;  %v227_v10 = vld [vmem:[#allocation4 + $0x1c8] sm:$0xff]  ;;  %v92_v12 = vld [vmem:[#allocation2 + $0x50] sm:$0xff] }
  0x2b   :  { %972 = vmatprep.subr.mxu0 %v1156_v1  ;;  %321 = vmatpush1.msra.mxu1 %v230_v9  ;;  %v226_v11 = vld [vmem:[#allocation4 + $0x1c0] sm:$0xff]  ;;  %v223_v13 = vld [vmem:[#allocation4 + $0x1a8] sm:$0xff]  ;;  %v89_v22 = vld [vmem:[#allocation2 + $0x38] sm:$0xff] }
  0x2c   :  { %973 = vmatpush3.msra.mxu0 %v96_v4  ;;  %322 = vmatprep.subr.mxu1 %v227_v10  ;;  %v222_v14 = vld [vmem:[#allocation4 + $0x1a0] sm:$0xff]  ;;  %v219_v15 = vld [vmem:[#allocation4 + $0x188] sm:$0xff]  ;;  %v88_v25 = vld [vmem:[#allocation2 + $0x30] sm:$0xff] }
  0x2d   :  { %974 = vmatprep.subr.mxu0 %v1156_v1  ;;  %323 = vmatpush1.msra.mxu1 %v226_v11  ;;  %v91_v16 = vld [vmem:[#allocation2 + $0x48] sm:$0xff]  ;;  %v218_v17 = vld [vmem:[#allocation4 + $0x180] sm:$0xff]  ;;  %v85_v34 = vld [vmem:[#allocation2 + $0x18] sm:$0xff] }
  0x2e   :  { %975 = vmatpush3.msra.mxu0 %v95_v5  ;;  %324 = vmatprep.subr.mxu1 %v223_v13  ;;  %v215_v18 = vld [vmem:[#allocation4 + $0x168] sm:$0xff]  ;;  %v90_v19 = vld [vmem:[#allocation2 + $0x40] sm:$0xff]  ;;  %v84_v37 = vld [vmem:[#allocation2 + $0x10] sm:$0xff] }
  0x2f   :  { %976 = vmatprep.subr.mxu0 %v1156_v1  ;;  %325 = vmatpush1.msra.mxu1 %v222_v14  ;;  %v214_v20 = vld [vmem:[#allocation4 + $0x160] sm:$0xff]  ;;  %v211_v21 = vld [vmem:[#allocation4 + $0x148] sm:$0xff]  ;;  %v233_v45 = vld [vmem:[#allocation4 + $0x1f8] sm:$0xff] }
  0x30   :  { %977 = vmatpush3.msra.mxu0 %v94_v6  ;;  %326 = vmatprep.subr.mxu1 %v219_v15  ;;  %v210_v23 = vld [vmem:[#allocation4 + $0x140] sm:$0xff]  ;;  %v207_v24 = vld [vmem:[#allocation4 + $0x128] sm:$0xff] }
  0x31   :  { %978 = vmatprep.subr.mxu0 %v1156_v1  ;;  %327 = vmatpush1.msra.mxu1 %v218_v17  ;;  %v206_v26 = vld [vmem:[#allocation4 + $0x120] sm:$0xff]  ;;  %v203_v27 = vld [vmem:[#allocation4 + $0x108] sm:$0xff] }
  0x32   :  { %979 = vmatpush3.msra.mxu0 %v93_v8  ;;  %328 = vmatprep.subr.mxu1 %v215_v18  ;;  %v87_v28 = vld [vmem:[#allocation2 + $0x28] sm:$0xff]  ;;  %v202_v29 = vld [vmem:[#allocation4 + $0x100] sm:$0xff] }
  0x33   :  { %980 = vmatprep.subr.mxu0 %v1156_v1  ;;  %329 = vmatpush1.msra.mxu1 %v214_v20  ;;  %v199_v30 = vld [vmem:[#allocation4 + $0xe8] sm:$0xff]  ;;  %v86_v31 = vld [vmem:[#allocation2 + $0x20] sm:$0xff]  ;;  %v74_v20 = vlaneseq }
  0x34   :  { %981 = vmatpush3.msra.mxu0 %v92_v12  ;;  %330 = vmatprep.subr.mxu1 %v211_v21  ;;  %v198_v32 = vld [vmem:[#allocation4 + $0xe0] sm:$0xff]  ;;  %v195_v33 = vld [vmem:[#allocation4 + $0xc8] sm:$0xff] }
  0x35   :  { %982 = vmatprep.subr.mxu0 %v1156_v1  ;;  %331 = vmatpush1.msra.mxu1 %v210_v23  ;;  %v194_v35 = vld [vmem:[#allocation4 + $0xc0] sm:$0xff]  ;;  %v191_v36 = vld [vmem:[#allocation4 + $0xa8] sm:$0xff]  ;;  %v75_v21 = vand.u32 127, %v74_v20  ;;  %v232_v23 = vld [vmem:[#allocation4 + $0x1f0] sm:$0xff] }
  0x36   :  { %983 = vmatpush3.msra.mxu0 %v91_v16  ;;  %332 = vmatprep.subr.mxu1 %v207_v24  ;;  %v190_v38 = vld [vmem:[#allocation4 + $0xa0] sm:$0xff]  ;;  %v187_v39 = vld [vmem:[#allocation4 + $0x88] sm:$0xff]  ;;  %v229_v24 = vld [vmem:[#allocation4 + $0x1d8] sm:$0xff] }
  0x37   :  { %984 = vmatprep.subr.mxu0 %v1156_v1  ;;  %333 = vmatpush1.msra.mxu1 %v206_v26  ;;  %v83_v40 = vld [vmem:[#allocation2 + $0x8] sm:$0xff]  ;;  %v186_v41 = vld [vmem:[#allocation4 + $0x80] sm:$0xff]  ;;  %v228_v26 = vld [vmem:[#allocation4 + $0x1d0] sm:$0xff] }
  0x38   :  { %985 = vmatpush3.msra.mxu0 %v90_v19  ;;  %334 = vmatprep.subr.mxu1 %v203_v27  ;;  %v183_v42 = vld [vmem:[#allocation4 + $0x68] sm:$0xff]  ;;  %v82_v43 = vld [vmem:[#allocation2] sm:$0xff]  ;;  %v225_v27 = vld [vmem:[#allocation4 + $0x1b8] sm:$0xff] }
  0x39   :  { %986 = vmatprep.subr.mxu0 %v1156_v1  ;;  %335 = vmatpush1.msra.mxu1 %v202_v29  ;;  %v182_v44 = vld [vmem:[#allocation4 + $0x60] sm:$0xff]  ;;  %v179_v46 = vld [vmem:[#allocation4 + $0x48] sm:$0xff]  ;;  %v221_v29 = vld [vmem:[#allocation4 + $0x198] sm:$0xff] }
  0x3a   :  { %987 = vmatpush3.msra.mxu0 %v89_v22  ;;  %336 = vmatprep.subr.mxu1 %v199_v30  ;;  %v178_v47 = vld [vmem:[#allocation4 + $0x40] sm:$0xff]  ;;  %v175_v48 = vld [vmem:[#allocation4 + $0x28] sm:$0xff]  ;;  %v220_v30 = vld [vmem:[#allocation4 + $0x190] sm:$0xff] }
  0x3b   :  { %988 = vmatprep.subr.mxu0 %v1156_v1  ;;  %337 = vmatpush1.msra.mxu1 %v198_v32  ;;  %v174_v49 = vld [vmem:[#allocation4 + $0x20] sm:$0xff]  ;;  %v171_v50 = vld [vmem:[#allocation4 + $0x8] sm:$0xff]  ;;  %v216_v32 = vld [vmem:[#allocation4 + $0x170] sm:$0xff] }
  0x3c   :  { %989 = vmatpush3.msra.mxu0 %v88_v25  ;;  %338 = vmatprep.subr.mxu1 %v195_v33  ;;  %v170_v51 = vld [vmem:[#allocation4] sm:$0xff]  ;;  %v295_v52 = vld [vmem:[#allocation4 + $0x3e8] sm:$0xff]  ;;  %v1158_v25 = vmov 1.0   ;;  %v213_v33 = vld [vmem:[#allocation4 + $0x158] sm:$0xff] }
  0x3d   :  { %990 = vmatprep.subr.mxu0 %v1156_v1  ;;  %339 = vmatpush1.msra.mxu1 %v194_v35  ;;  %v294_v53 = vld [vmem:[#allocation4 + $0x3e0] sm:$0xff]  ;;  %v291_v54 = vld [vmem:[#allocation4 + $0x3c8] sm:$0xff]  ;;  %v209_v35 = vld [vmem:[#allocation4 + $0x138] sm:$0xff] }
  0x3e   :  { %991 = vmatpush3.msra.mxu0 %v87_v28  ;;  %340 = vmatprep.subr.mxu1 %v191_v36  ;;  %v290_v55 = vld [vmem:[#allocation4 + $0x3c0] sm:$0xff]  ;;  %v287_v56 = vld [vmem:[#allocation4 + $0x3a8] sm:$0xff]  ;;  %v224_v28 = vld [vmem:[#allocation4 + $0x1b0] sm:$0xff] }
  0x3f   :  { %992 = vmatprep.subr.mxu0 %v1156_v1  ;;  %341 = vmatpush1.msra.mxu1 %v190_v38  ;;  %v286_v57 = vld [vmem:[#allocation4 + $0x3a0] sm:$0xff]  ;;  %v283_v58 = vld [vmem:[#allocation4 + $0x388] sm:$0xff]  ;;  %v208_v36 = vld [vmem:[#allocation4 + $0x130] sm:$0xff] }
  0x40   :  { %993 = vmatpush3.msra.mxu0 %v86_v31  ;;  %342 = vmatprep.subr.mxu1 %v187_v39  ;;  %v282_v59 = vld [vmem:[#allocation4 + $0x380] sm:$0xff]  ;;  %v279_v60 = vld [vmem:[#allocation4 + $0x368] sm:$0xff]  ;;  %v217_v31 = vld [vmem:[#allocation4 + $0x178] sm:$0xff] }
  0x41   :  { %994 = vmatprep.subr.mxu0 %v1156_v1  ;;  %343 = vmatpush1.msra.mxu1 %v186_v41  ;;  %v278_v61 = vld [vmem:[#allocation4 + $0x360] sm:$0xff]  ;;  %v275_v62 = vld [vmem:[#allocation4 + $0x348] sm:$0xff]  ;;  %v204_v38 = vld [vmem:[#allocation4 + $0x110] sm:$0xff] }
  0x42   :  { %995 = vmatpush3.msra.mxu0 %v85_v34  ;;  %344 = vmatprep.subr.mxu1 %v183_v42  ;;  %v274_v63 = vld [vmem:[#allocation4 + $0x340] sm:$0xff]  ;;  %v271_v0 = vld [vmem:[#allocation4 + $0x328] sm:$0xff]  ;;  %v212_v34 = vld [vmem:[#allocation4 + $0x150] sm:$0xff] }
  0x43   :  { %996 = vmatprep.subr.mxu0 %v1156_v1  ;;  %345 = vmatpush1.msra.mxu1 %v182_v44  ;;  %v270_v2 = vld [vmem:[#allocation4 + $0x320] sm:$0xff]  ;;  %v267_v3 = vld [vmem:[#allocation4 + $0x308] sm:$0xff]  ;;  %v201_v39 = vld [vmem:[#allocation4 + $0xf8] sm:$0xff] }
  0x44   :  { %997 = vmatpush3.msra.mxu0 %v84_v37  ;;  %346 = vmatprep.subr.mxu1 %v179_v46  ;;  %v266_v4 = vld [vmem:[#allocation4 + $0x300] sm:$0xff]  ;;  %v263_v5 = vld [vmem:[#allocation4 + $0x2e8] sm:$0xff]  ;;  %v205_v37 = vld [vmem:[#allocation4 + $0x118] sm:$0xff] }
  0x45   :  { %998 = vmatprep.subr.mxu0 %v1156_v1  ;;  %347 = vmatpush1.msra.mxu1 %v178_v47  ;;  %v262_v6 = vld [vmem:[#allocation4 + $0x2e0] sm:$0xff]  ;;  %v259_v7 = vld [vmem:[#allocation4 + $0x2c8] sm:$0xff]  ;;  %v197_v41 = vld [vmem:[#allocation4 + $0xd8] sm:$0xff] }
  0x46   :  { %999 = vmatpush3.msra.mxu0 %v83_v40  ;;  %348 = vmatprep.subr.mxu1 %v175_v48  ;;  %v258_v8 = vld [vmem:[#allocation4 + $0x2c0] sm:$0xff]  ;;  %v255_v9 = vld [vmem:[#allocation4 + $0x2a8] sm:$0xff]  ;;  %v200_v40 = vld [vmem:[#allocation4 + $0xf0] sm:$0xff] }
  0x47   :  { %1000 = vmatprep.subr.mxu0 %v1156_v1  ;;  %349 = vmatpush1.msra.mxu1 %v174_v49  ;;  %v254_v10 = vld [vmem:[#allocation4 + $0x2a0] sm:$0xff]  ;;  %v251_v11 = vld [vmem:[#allocation4 + $0x288] sm:$0xff]  ;;  %v196_v42 = vld [vmem:[#allocation4 + $0xd0] sm:$0xff] }
  0x48   :  { %1001 = vmatpush3.msra.mxu0 %v82_v43  ;;  %350 = vmatprep.subr.mxu1 %v171_v50  ;;  %v250_v12 = vld [vmem:[#allocation4 + $0x280] sm:$0xff]  ;;  %v247_v13 = vld [vmem:[#allocation4 + $0x268] sm:$0xff]  ;;  %v193_v43 = vld [vmem:[#allocation4 + $0xb8] sm:$0xff] }
  0x49   :  { %391 = vmatprep.subr.mxu0 %v233_v45  ;;  %351 = vmatpush1.msra.mxu1 %v170_v51  ;;  %v246_v14 = vld [vmem:[#allocation4 + $0x260] sm:$0xff]  ;;  %v243_v15 = vld [vmem:[#allocation4 + $0x248] sm:$0xff]  ;;  %v192_v44 = vld [vmem:[#allocation4 + $0xb0] sm:$0xff] }
  0x4a   :  { %352 = vmatprep.subr.mxu1 %v295_v52  ;;  %v242_v16 = vld [vmem:[#allocation4 + $0x240] sm:$0xff]  ;;  %v239_v17 = vld [vmem:[#allocation4 + $0x228] sm:$0xff]  ;;  %v189_v45 = vld [vmem:[#allocation4 + $0x98] sm:$0xff] }
  0x4b   :  { %353 = vmatpush2.msra.mxu1 %v294_v53  ;;  %v238_v18 = vld [vmem:[#allocation4 + $0x220] sm:$0xff]  ;;  %v235_v19 = vld [vmem:[#allocation4 + $0x208] sm:$0xff]  ;;  %v188_v46 = vld [vmem:[#allocation4 + $0x90] sm:$0xff] }
  0x4c   :  { %354 = vmatprep.subr.mxu1 %v291_v54  ;;  %v185_v47 = vld [vmem:[#allocation4 + $0x78] sm:$0xff]  ;;  %v184_v48 = vld [vmem:[#allocation4 + $0x70] sm:$0xff] }
  0x4d   :  { %355 = vmatpush2.msra.mxu1 %v290_v55  ;;  %v181_v49 = vld [vmem:[#allocation4 + $0x58] sm:$0xff]  ;;  %v180_v50 = vld [vmem:[#allocation4 + $0x50] sm:$0xff] }
  0x4e   :  { %356 = vmatprep.subr.mxu1 %v287_v56  ;;  %v177_v51 = vld [vmem:[#allocation4 + $0x38] sm:$0xff]  ;;  %v176_v52 = vld [vmem:[#allocation4 + $0x30] sm:$0xff] }
  0x4f   :  { %357 = vmatpush2.msra.mxu1 %v286_v57  ;;  %v173_v53 = vld [vmem:[#allocation4 + $0x18] sm:$0xff]  ;;  %v172_v54 = vld [vmem:[#allocation4 + $0x10] sm:$0xff] }
  0x50   :  { %358 = vmatprep.subr.mxu1 %v283_v58  ;;  %v297_v55 = vld [vmem:[#allocation4 + $0x3f8] sm:$0xff]  ;;  %v296_v56 = vld [vmem:[#allocation4 + $0x3f0] sm:$0xff] }
  0x51   :  { %359 = vmatpush2.msra.mxu1 %v282_v59  ;;  %v293_v57 = vld [vmem:[#allocation4 + $0x3d8] sm:$0xff]  ;;  %v292_v58 = vld [vmem:[#allocation4 + $0x3d0] sm:$0xff] }
  0x52   :  { %360 = vmatprep.subr.mxu1 %v279_v60  ;;  %v289_v59 = vld [vmem:[#allocation4 + $0x3b8] sm:$0xff]  ;;  %v288_v60 = vld [vmem:[#allocation4 + $0x3b0] sm:$0xff] }
  0x53   :  { %361 = vmatpush2.msra.mxu1 %v278_v61  ;;  %v285_v61 = vld [vmem:[#allocation4 + $0x398] sm:$0xff] }
  0x54   :  { %362 = vmatprep.subr.mxu1 %v275_v62  ;;  %v284_v62 = vld [vmem:[#allocation4 + $0x390] sm:$0xff] }
  0x55   :  { %363 = vmatpush2.msra.mxu1 %v274_v63  ;;  %v281_v63 = vld [vmem:[#allocation4 + $0x378] sm:$0xff] }
  0x56   :  { %364 = vmatprep.subr.mxu1 %v271_v0  ;;  %v280_v0 = vld [vmem:[#allocation4 + $0x370] sm:$0xff] }
  0x57   :  { %365 = vmatpush2.msra.mxu1 %v270_v2  ;;  %v277_v2 = vld [vmem:[#allocation4 + $0x358] sm:$0xff] }
  0x58   :  { %366 = vmatprep.subr.mxu1 %v267_v3  ;;  %v276_v3 = vld [vmem:[#allocation4 + $0x350] sm:$0xff] }
  0x59   :  { %367 = vmatpush2.msra.mxu1 %v266_v4  ;;  %v273_v4 = vld [vmem:[#allocation4 + $0x338] sm:$0xff] }
  0x5a   :  { %368 = vmatprep.subr.mxu1 %v263_v5  ;;  %v272_v5 = vld [vmem:[#allocation4 + $0x330] sm:$0xff] }
  0x5b   :  { %369 = vmatpush2.msra.mxu1 %v262_v6  ;;  %v269_v6 = vld [vmem:[#allocation4 + $0x318] sm:$0xff] }
  0x5c   :  { %370 = vmatprep.subr.mxu1 %v259_v7  ;;  %v268_v7 = vld [vmem:[#allocation4 + $0x310] sm:$0xff] }
  0x5d   :  { %371 = vmatpush2.msra.mxu1 %v258_v8  ;;  %v265_v8 = vld [vmem:[#allocation4 + $0x2f8] sm:$0xff] }
  0x5e   :  { %372 = vmatprep.subr.mxu1 %v255_v9  ;;  %v264_v9 = vld [vmem:[#allocation4 + $0x2f0] sm:$0xff] }
  0x5f   :  { %373 = vmatpush2.msra.mxu1 %v254_v10  ;;  %v261_v10 = vld [vmem:[#allocation4 + $0x2d8] sm:$0xff] }
  0x60   :  { %374 = vmatprep.subr.mxu1 %v251_v11  ;;  %v260_v11 = vld [vmem:[#allocation4 + $0x2d0] sm:$0xff] }
  0x61   :  { %375 = vmatpush2.msra.mxu1 %v250_v12  ;;  %v257_v12 = vld [vmem:[#allocation4 + $0x2b8] sm:$0xff] }
  0x62   :  { %376 = vmatprep.subr.mxu1 %v247_v13  ;;  %v256_v13 = vld [vmem:[#allocation4 + $0x2b0] sm:$0xff] }
  0x63   :  { %377 = vmatpush2.msra.mxu1 %v246_v14  ;;  %v253_v14 = vld [vmem:[#allocation4 + $0x298] sm:$0xff] }
  0x64   :  { %378 = vmatprep.subr.mxu1 %v243_v15  ;;  %v252_v15 = vld [vmem:[#allocation4 + $0x290] sm:$0xff] }
  0x65   :  { %379 = vmatpush2.msra.mxu1 %v242_v16  ;;  %v249_v16 = vld [vmem:[#allocation4 + $0x278] sm:$0xff] }
  0x66   :  { %380 = vmatprep.subr.mxu1 %v239_v17  ;;  %v248_v17 = vld [vmem:[#allocation4 + $0x270] sm:$0xff] }
  0x67   :  { %381 = vmatpush2.msra.mxu1 %v238_v18  ;;  %v245_v18 = vld [vmem:[#allocation4 + $0x258] sm:$0xff] }
  0x68   :  { %382 = vmatprep.subr.mxu1 %v235_v19  ;;  %v244_v19 = vld [vmem:[#allocation4 + $0x250] sm:$0xff] }
  0xa4   :  { %v78_v22 = vpop.permute.xlu0 %77 }
  0xa5   :  { %vm79_vm1 = vcmp.eq.s32.totalorder %v75_v21, %v78_v22  ;;  %v241_v21 = vld [vmem:[#allocation4 + $0x238] sm:$0xff]  ;;  %v240_v22 = vld [vmem:[#allocation4 + $0x230] sm:$0xff] }
  0xa6   :  { %1003 = vmatmul.mubr.msk.f32.vlgmr.msra.gmra.mxu0 %vm79_vm1, %v1158_v25  ;;  %v168_v25 = vld [vmem:[%s1324_s2] sm:$0xff] }
  0xa7   :  { %392 = vmatpush1.msra.mxu0 %v232_v23  ;;  %v237_v23 = vld [vmem:[#allocation4 + $0x218] sm:$0xff]  ;;  %384 = vmatprep.mubr.f32.mxu1 %v168_v25 }
  0xa8   :  { %393 = vmatprep.subr.mxu0 %v229_v24  ;;  %v234_v24 = vld [vmem:[#allocation4 + $0x200] sm:$0xff]  ;;  %455 = vmatprep.mubr.f32.mxu0 %v168_v25 }
  0xa9   :  { %394 = vmatpush1.msra.mxu0 %v228_v26  ;;  %v236_v26 = vld [vmem:[#allocation4 + $0x210] sm:$0xff]  ;;  %383 = vmatpush2.msra.mxu1 %v234_v24  ;;  %v500_v24 = vld [vmem:[#allocation4 + $0x438] sm:$0xff]  ;;  %v497_v25 = vld [vmem:[#allocation4 + $0x420] sm:$0xff] }
  0xaa   :  { %395 = vmatprep.subr.mxu0 %v225_v27  ;;  %v554_v27 = vld [vmem:[#allocation4 + $0x5e8] sm:$0xff] }
  0xab   :  { %396 = vmatpush1.msra.mxu0 %v224_v28  ;;  %v556_v28 = vld [vmem:[#allocation4 + $0x5f8] sm:$0xff]  ;;  %644 = vmatprep.subr.mxu1 %v554_v27  ;;  %v494_v27 = vld [vmem:[#allocation4 + $0x408] sm:$0xff] }
  0xac   :  { %397 = vmatprep.subr.mxu0 %v221_v29  ;;  %v553_v29 = vld [vmem:[#allocation4 + $0x5e0] sm:$0xff] }
  0xad   :  { %398 = vmatpush1.msra.mxu0 %v220_v30  ;;  %v555_v30 = vld [vmem:[#allocation4 + $0x5f0] sm:$0xff] }
  0xae   :  { %399 = vmatprep.subr.mxu0 %v217_v31 }
  0xaf   :  { %400 = vmatpush1.msra.mxu0 %v216_v32  ;;  %v550_v32 = vld [vmem:[#allocation4 + $0x5c8] sm:$0xff] }
  0xb0   :  { %401 = vmatprep.subr.mxu0 %v213_v33  ;;  %v552_v33 = vld [vmem:[#allocation4 + $0x5d8] sm:$0xff] }
  0xb1   :  { %402 = vmatpush1.msra.mxu0 %v212_v34  ;;  %v549_v34 = vld [vmem:[#allocation4 + $0x5c0] sm:$0xff] }
  0xb2   :  { %403 = vmatprep.subr.mxu0 %v209_v35  ;;  %v551_v35 = vld [vmem:[#allocation4 + $0x5d0] sm:$0xff] }
  0xb3   :  { %404 = vmatpush1.msra.mxu0 %v208_v36 }
  0xb4   :  { %405 = vmatprep.subr.mxu0 %v205_v37  ;;  %v546_v37 = vld [vmem:[#allocation4 + $0x5a8] sm:$0xff] }
  0xb5   :  { %406 = vmatpush1.msra.mxu0 %v204_v38  ;;  %v548_v38 = vld [vmem:[#allocation4 + $0x5b8] sm:$0xff] }
  0xb6   :  { %407 = vmatprep.subr.mxu0 %v201_v39  ;;  %v545_v39 = vld [vmem:[#allocation4 + $0x5a0] sm:$0xff] }
  0xb7   :  { %408 = vmatpush1.msra.mxu0 %v200_v40  ;;  %v547_v40 = vld [vmem:[#allocation4 + $0x5b0] sm:$0xff] }
  0xb8   :  { %409 = vmatprep.subr.mxu0 %v197_v41  ;;  %v542_v41 = vld [vmem:[#allocation4 + $0x588] sm:$0xff] }
  0xb9   :  { %410 = vmatpush1.msra.mxu0 %v196_v42  ;;  %v544_v42 = vld [vmem:[#allocation4 + $0x598] sm:$0xff] }
  0xba   :  { %411 = vmatprep.subr.mxu0 %v193_v43  ;;  %v541_v43 = vld [vmem:[#allocation4 + $0x580] sm:$0xff] }
  0xbb   :  { %412 = vmatpush1.msra.mxu0 %v192_v44  ;;  %v543_v44 = vld [vmem:[#allocation4 + $0x590] sm:$0xff] }
  0xbc   :  { %413 = vmatprep.subr.mxu0 %v189_v45  ;;  %v538_v45 = vld [vmem:[#allocation4 + $0x568] sm:$0xff] }
  0xbd   :  { %414 = vmatpush1.msra.mxu0 %v188_v46  ;;  %v540_v46 = vld [vmem:[#allocation4 + $0x578] sm:$0xff] }
  0xbe   :  { %415 = vmatprep.subr.mxu0 %v185_v47  ;;  %v537_v47 = vld [vmem:[#allocation4 + $0x560] sm:$0xff] }
  0xbf   :  { %416 = vmatpush1.msra.mxu0 %v184_v48  ;;  %v539_v48 = vld [vmem:[#allocation4 + $0x570] sm:$0xff] }
  0xc0   :  { %417 = vmatprep.subr.mxu0 %v181_v49  ;;  %v534_v49 = vld [vmem:[#allocation4 + $0x548] sm:$0xff] }
  0xc1   :  { %418 = vmatpush1.msra.mxu0 %v180_v50  ;;  %v536_v50 = vld [vmem:[#allocation4 + $0x558] sm:$0xff] }
  0xc2   :  { %419 = vmatprep.subr.mxu0 %v177_v51  ;;  %v533_v51 = vld [vmem:[#allocation4 + $0x540] sm:$0xff] }
  0xc3   :  { %420 = vmatpush1.msra.mxu0 %v176_v52  ;;  %v535_v52 = vld [vmem:[#allocation4 + $0x550] sm:$0xff] }
  0xc4   :  { %421 = vmatprep.subr.mxu0 %v173_v53  ;;  %v530_v53 = vld [vmem:[#allocation4 + $0x528] sm:$0xff] }
  0xc5   :  { %422 = vmatpush1.msra.mxu0 %v172_v54  ;;  %v532_v54 = vld [vmem:[#allocation4 + $0x538] sm:$0xff] }
  0xc6   :  { %423 = vmatprep.subr.mxu0 %v297_v55  ;;  %v529_v55 = vld [vmem:[#allocation4 + $0x520] sm:$0xff] }
  0xc7   :  { %424 = vmatpush2.msra.mxu0 %v296_v56  ;;  %v531_v56 = vld [vmem:[#allocation4 + $0x530] sm:$0xff] }
  0xc8   :  { %425 = vmatprep.subr.mxu0 %v293_v57  ;;  %v526_v57 = vld [vmem:[#allocation4 + $0x508] sm:$0xff] }
  0xc9   :  { %426 = vmatpush2.msra.mxu0 %v292_v58  ;;  %v528_v58 = vld [vmem:[#allocation4 + $0x518] sm:$0xff] }
  0xca   :  { %427 = vmatprep.subr.mxu0 %v289_v59  ;;  %v525_v59 = vld [vmem:[#allocation4 + $0x500] sm:$0xff] }
  0xcb   :  { %428 = vmatpush2.msra.mxu0 %v288_v60  ;;  %v527_v60 = vld [vmem:[#allocation4 + $0x510] sm:$0xff] }
  0xcc   :  { %429 = vmatprep.subr.mxu0 %v285_v61  ;;  %v522_v61 = vld [vmem:[#allocation4 + $0x4e8] sm:$0xff] }
  0xcd   :  { %430 = vmatpush2.msra.mxu0 %v284_v62  ;;  %v524_v62 = vld [vmem:[#allocation4 + $0x4f8] sm:$0xff] }
  0xce   :  { %431 = vmatprep.subr.mxu0 %v281_v63  ;;  %v521_v63 = vld [vmem:[#allocation4 + $0x4e0] sm:$0xff] }
  0xcf   :  { %432 = vmatpush2.msra.mxu0 %v280_v0  ;;  %v523_v0 = vld [vmem:[#allocation4 + $0x4f0] sm:$0xff] }
  0xd0   :  { %433 = vmatprep.subr.mxu0 %v277_v2  ;;  %v518_v2 = vld [vmem:[#allocation4 + $0x4c8] sm:$0xff] }
  0xd1   :  { %434 = vmatpush2.msra.mxu0 %v276_v3  ;;  %v520_v3 = vld [vmem:[#allocation4 + $0x4d8] sm:$0xff] }
  0xd2   :  { %435 = vmatprep.subr.mxu0 %v273_v4  ;;  %v517_v4 = vld [vmem:[#allocation4 + $0x4c0] sm:$0xff] }
  0xd3   :  { %436 = vmatpush2.msra.mxu0 %v272_v5  ;;  %v519_v5 = vld [vmem:[#allocation4 + $0x4d0] sm:$0xff] }
  0xd4   :  { %437 = vmatprep.subr.mxu0 %v269_v6  ;;  %v514_v6 = vld [vmem:[#allocation4 + $0x4a8] sm:$0xff] }
  0xd5   :  { %438 = vmatpush2.msra.mxu0 %v268_v7  ;;  %v516_v7 = vld [vmem:[#allocation4 + $0x4b8] sm:$0xff] }
  0xd6   :  { %439 = vmatprep.subr.mxu0 %v265_v8  ;;  %v513_v8 = vld [vmem:[#allocation4 + $0x4a0] sm:$0xff] }
  0xd7   :  { %440 = vmatpush2.msra.mxu0 %v264_v9  ;;  %v515_v9 = vld [vmem:[#allocation4 + $0x4b0] sm:$0xff] }
  0xd8   :  { %441 = vmatprep.subr.mxu0 %v261_v10  ;;  %v510_v10 = vld [vmem:[#allocation4 + $0x488] sm:$0xff] }
  0xd9   :  { %442 = vmatpush2.msra.mxu0 %v260_v11  ;;  %v512_v11 = vld [vmem:[#allocation4 + $0x498] sm:$0xff] }
  0xda   :  { %443 = vmatprep.subr.mxu0 %v257_v12  ;;  %v509_v12 = vld [vmem:[#allocation4 + $0x480] sm:$0xff] }
  0xdb   :  { %444 = vmatpush2.msra.mxu0 %v256_v13  ;;  %v511_v13 = vld [vmem:[#allocation4 + $0x490] sm:$0xff] }
  0xdc   :  { %445 = vmatprep.subr.mxu0 %v253_v14  ;;  %v506_v14 = vld [vmem:[#allocation4 + $0x468] sm:$0xff] }
  0xdd   :  { %446 = vmatpush2.msra.mxu0 %v252_v15  ;;  %v508_v15 = vld [vmem:[#allocation4 + $0x478] sm:$0xff] }
  0xde   :  { %447 = vmatprep.subr.mxu0 %v249_v16  ;;  %v505_v16 = vld [vmem:[#allocation4 + $0x460] sm:$0xff] }
  0xdf   :  { %448 = vmatpush2.msra.mxu0 %v248_v17  ;;  %v507_v17 = vld [vmem:[#allocation4 + $0x470] sm:$0xff] }
  0xe0   :  { %449 = vmatprep.subr.mxu0 %v245_v18  ;;  %v502_v18 = vld [vmem:[#allocation4 + $0x448] sm:$0xff] }
  0xe1   :  { %450 = vmatpush2.msra.mxu0 %v244_v19  ;;  %v504_v19 = vld [vmem:[#allocation4 + $0x458] sm:$0xff] }
  0xe2   :  { %451 = vmatprep.subr.mxu0 %v241_v21  ;;  %v501_v21 = vld [vmem:[#allocation4 + $0x440] sm:$0xff] }
  0xe3   :  { %452 = vmatpush2.msra.mxu0 %v240_v22  ;;  %v503_v22 = vld [vmem:[#allocation4 + $0x450] sm:$0xff] }
  0xe4   :  { %453 = vmatprep.subr.mxu0 %v237_v23  ;;  %v498_v23 = vld [vmem:[#allocation4 + $0x428] sm:$0xff] }
  0xe5   :  { %454 = vmatpush2.msra.mxu0 %v236_v26  ;;  %v499_v26 = vld [vmem:[#allocation4 + $0x430] sm:$0xff] }
  0xe6   :  { %715 = vmatprep.subr.mxu0 %v556_v28  ;;  %v496_v28 = vld [vmem:[#allocation4 + $0x418] sm:$0xff] }
 0x166   :  { %v164_v31 = vpop.f32.mrf.mxu0 }
 0x167   :  { %385 = vmatmul.mubr.f32.vlgmr.msra.gmra.mxu1 %v164_v31  ;;  %456 = vmatmul.mubr.f32.vlgmr.msra.gmra.mxu0 %v164_v31  ;;  %v618_v31 = vld [vmem:[#allocation4 + $0x7e8] sm:$0xff] }
 0x168   :  { %v1004_v36 = vpop.f32.mrf.mxu0  ;;  %645 = vmatpush1.msra.mxu1 %v553_v29  ;;  %716 = vmatpush1.msra.mxu0 %v555_v30  ;;  %v493_v29 = vld [vmem:[#allocation4 + $0x400] sm:$0xff]  ;;  %v495_v30 = vld [vmem:[#allocation4 + $0x410] sm:$0xff] }
 0x169   :  { %646 = vmatprep.subr.mxu1 %v550_v32  ;;  %717 = vmatprep.subr.mxu0 %v552_v33  ;;  %v620_v32 = vld [vmem:[#allocation4 + $0x7f8] sm:$0xff]  ;;  %v617_v33 = vld [vmem:[#allocation4 + $0x7e0] sm:$0xff] }
 0x16a   :  { %647 = vmatpush1.msra.mxu1 %v549_v34  ;;  %718 = vmatpush1.msra.mxu0 %v551_v35  ;;  %v619_v34 = vld [vmem:[#allocation4 + $0x7f0] sm:$0xff]  ;;  %v614_v35 = vld [vmem:[#allocation4 + $0x7c8] sm:$0xff]  ;;  %v616_v36 = vld [vmem:[#allocation4 + $0x7d8] sm:$0xff] }
 0x16b   :  { %648 = vmatprep.subr.mxu1 %v546_v37  ;;  %719 = vmatprep.subr.mxu0 %v548_v38  ;;  %v613_v37 = vld [vmem:[#allocation4 + $0x7c0] sm:$0xff]  ;;  %v615_v38 = vld [vmem:[#allocation4 + $0x7d0] sm:$0xff] }
 0x16c   :  { %649 = vmatpush1.msra.mxu1 %v545_v39  ;;  %720 = vmatpush1.msra.mxu0 %v547_v40  ;;  %v610_v39 = vld [vmem:[#allocation4 + $0x7a8] sm:$0xff]  ;;  %v612_v40 = vld [vmem:[#allocation4 + $0x7b8] sm:$0xff] }
 0x16d   :  { %650 = vmatprep.subr.mxu1 %v542_v41  ;;  %721 = vmatprep.subr.mxu0 %v544_v42  ;;  %v609_v41 = vld [vmem:[#allocation4 + $0x7a0] sm:$0xff]  ;;  %v611_v42 = vld [vmem:[#allocation4 + $0x7b0] sm:$0xff] }
 0x16e   :  { %651 = vmatpush1.msra.mxu1 %v541_v43  ;;  %722 = vmatpush1.msra.mxu0 %v543_v44  ;;  %v606_v43 = vld [vmem:[#allocation4 + $0x788] sm:$0xff]  ;;  %v608_v44 = vld [vmem:[#allocation4 + $0x798] sm:$0xff] }
 0x16f   :  { %652 = vmatprep.subr.mxu1 %v538_v45  ;;  %723 = vmatprep.subr.mxu0 %v540_v46  ;;  %v605_v45 = vld [vmem:[#allocation4 + $0x780] sm:$0xff]  ;;  %v607_v46 = vld [vmem:[#allocation4 + $0x790] sm:$0xff] }
 0x170   :  { %653 = vmatpush1.msra.mxu1 %v537_v47  ;;  %724 = vmatpush1.msra.mxu0 %v539_v48  ;;  %v602_v47 = vld [vmem:[#allocation4 + $0x768] sm:$0xff]  ;;  %v604_v48 = vld [vmem:[#allocation4 + $0x778] sm:$0xff] }
 0x171   :  { %654 = vmatprep.subr.mxu1 %v534_v49  ;;  %725 = vmatprep.subr.mxu0 %v536_v50  ;;  %v601_v49 = vld [vmem:[#allocation4 + $0x760] sm:$0xff]  ;;  %v603_v50 = vld [vmem:[#allocation4 + $0x770] sm:$0xff] }
 0x172   :  { %655 = vmatpush1.msra.mxu1 %v533_v51  ;;  %726 = vmatpush1.msra.mxu0 %v535_v52  ;;  %v598_v51 = vld [vmem:[#allocation4 + $0x748] sm:$0xff]  ;;  %v600_v52 = vld [vmem:[#allocation4 + $0x758] sm:$0xff] }
 0x173   :  { %656 = vmatprep.subr.mxu1 %v530_v53  ;;  %727 = vmatprep.subr.mxu0 %v532_v54  ;;  %v597_v53 = vld [vmem:[#allocation4 + $0x740] sm:$0xff]  ;;  %v599_v54 = vld [vmem:[#allocation4 + $0x750] sm:$0xff] }
 0x174   :  { %657 = vmatpush1.msra.mxu1 %v529_v55  ;;  %728 = vmatpush1.msra.mxu0 %v531_v56  ;;  %v594_v55 = vld [vmem:[#allocation4 + $0x728] sm:$0xff]  ;;  %v596_v56 = vld [vmem:[#allocation4 + $0x738] sm:$0xff] }
 0x175   :  { %658 = vmatprep.subr.mxu1 %v526_v57  ;;  %729 = vmatprep.subr.mxu0 %v528_v58  ;;  %v593_v57 = vld [vmem:[#allocation4 + $0x720] sm:$0xff]  ;;  %v595_v58 = vld [vmem:[#allocation4 + $0x730] sm:$0xff] }
 0x176   :  { %659 = vmatpush1.msra.mxu1 %v525_v59  ;;  %730 = vmatpush1.msra.mxu0 %v527_v60  ;;  %v590_v59 = vld [vmem:[#allocation4 + $0x708] sm:$0xff]  ;;  %v592_v60 = vld [vmem:[#allocation4 + $0x718] sm:$0xff] }
 0x177   :  { %660 = vmatprep.subr.mxu1 %v522_v61  ;;  %731 = vmatprep.subr.mxu0 %v524_v62  ;;  %v589_v61 = vld [vmem:[#allocation4 + $0x700] sm:$0xff]  ;;  %v591_v62 = vld [vmem:[#allocation4 + $0x710] sm:$0xff] }
 0x178   :  { %661 = vmatpush1.msra.mxu1 %v521_v63  ;;  %732 = vmatpush1.msra.mxu0 %v523_v0  ;;  %v586_v63 = vld [vmem:[#allocation4 + $0x6e8] sm:$0xff]  ;;  %v588_v0 = vld [vmem:[#allocation4 + $0x6f8] sm:$0xff] }
 0x179   :  { %662 = vmatprep.subr.mxu1 %v518_v2  ;;  %733 = vmatprep.subr.mxu0 %v520_v3  ;;  %v585_v2 = vld [vmem:[#allocation4 + $0x6e0] sm:$0xff]  ;;  %v587_v3 = vld [vmem:[#allocation4 + $0x6f0] sm:$0xff] }
 0x17a   :  { %663 = vmatpush1.msra.mxu1 %v517_v4  ;;  %734 = vmatpush1.msra.mxu0 %v519_v5  ;;  %v582_v4 = vld [vmem:[#allocation4 + $0x6c8] sm:$0xff]  ;;  %v584_v5 = vld [vmem:[#allocation4 + $0x6d8] sm:$0xff] }
 0x17b   :  { %664 = vmatprep.subr.mxu1 %v514_v6  ;;  %735 = vmatprep.subr.mxu0 %v516_v7  ;;  %v581_v6 = vld [vmem:[#allocation4 + $0x6c0] sm:$0xff]  ;;  %v583_v7 = vld [vmem:[#allocation4 + $0x6d0] sm:$0xff] }
 0x17c   :  { %665 = vmatpush1.msra.mxu1 %v513_v8  ;;  %736 = vmatpush1.msra.mxu0 %v515_v9  ;;  %v578_v8 = vld [vmem:[#allocation4 + $0x6a8] sm:$0xff]  ;;  %v580_v9 = vld [vmem:[#allocation4 + $0x6b8] sm:$0xff] }
 0x17d   :  { %666 = vmatprep.subr.mxu1 %v510_v10  ;;  %737 = vmatprep.subr.mxu0 %v512_v11  ;;  %v577_v10 = vld [vmem:[#allocation4 + $0x6a0] sm:$0xff]  ;;  %v579_v11 = vld [vmem:[#allocation4 + $0x6b0] sm:$0xff] }
 0x17e   :  { %667 = vmatpush1.msra.mxu1 %v509_v12  ;;  %738 = vmatpush1.msra.mxu0 %v511_v13  ;;  %v574_v12 = vld [vmem:[#allocation4 + $0x688] sm:$0xff]  ;;  %v576_v13 = vld [vmem:[#allocation4 + $0x698] sm:$0xff] }
 0x17f   :  { %668 = vmatprep.subr.mxu1 %v506_v14  ;;  %739 = vmatprep.subr.mxu0 %v508_v15  ;;  %v573_v14 = vld [vmem:[#allocation4 + $0x680] sm:$0xff]  ;;  %v575_v15 = vld [vmem:[#allocation4 + $0x690] sm:$0xff] }
 0x180   :  { %669 = vmatpush1.msra.mxu1 %v505_v16  ;;  %740 = vmatpush1.msra.mxu0 %v507_v17  ;;  %v570_v16 = vld [vmem:[#allocation4 + $0x668] sm:$0xff]  ;;  %v572_v17 = vld [vmem:[#allocation4 + $0x678] sm:$0xff] }
 0x181   :  { %670 = vmatprep.subr.mxu1 %v502_v18  ;;  %741 = vmatprep.subr.mxu0 %v504_v19  ;;  %v569_v18 = vld [vmem:[#allocation4 + $0x660] sm:$0xff]  ;;  %v571_v19 = vld [vmem:[#allocation4 + $0x670] sm:$0xff] }
 0x182   :  { %671 = vmatpush1.msra.mxu1 %v501_v21  ;;  %742 = vmatpush1.msra.mxu0 %v503_v22  ;;  %v566_v21 = vld [vmem:[#allocation4 + $0x648] sm:$0xff]  ;;  %v568_v22 = vld [vmem:[#allocation4 + $0x658] sm:$0xff] }
 0x183   :  { %672 = vmatprep.subr.mxu1 %v498_v23  ;;  %743 = vmatprep.subr.mxu0 %v500_v24  ;;  %v565_v23 = vld [vmem:[#allocation4 + $0x640] sm:$0xff]  ;;  %v567_v24 = vld [vmem:[#allocation4 + $0x650] sm:$0xff] }
 0x184   :  { %673 = vmatpush1.msra.mxu1 %v497_v25  ;;  %744 = vmatpush1.msra.mxu0 %v499_v26  ;;  %v562_v25 = vld [vmem:[#allocation4 + $0x628] sm:$0xff]  ;;  %v564_v26 = vld [vmem:[#allocation4 + $0x638] sm:$0xff] }
 0x185   :  { %674 = vmatprep.subr.mxu1 %v494_v27  ;;  %745 = vmatprep.subr.mxu0 %v496_v28  ;;  %v561_v27 = vld [vmem:[#allocation4 + $0x620] sm:$0xff]  ;;  %v563_v28 = vld [vmem:[#allocation4 + $0x630] sm:$0xff] }
 0x186   :  { %675 = vmatpush1.msra.mxu1 %v493_v29  ;;  %746 = vmatpush1.msra.mxu0 %v495_v30  ;;  %v558_v29 = vld [vmem:[#allocation4 + $0x608] sm:$0xff]  ;;  %v560_v30 = vld [vmem:[#allocation4 + $0x618] sm:$0xff] }
 0x187   :  { %676 = vmatprep.subr.mxu1 %v618_v31  ;;  %747 = vmatprep.subr.mxu0 %v620_v32  ;;  %v557_v31 = vld [vmem:[#allocation4 + $0x600] sm:$0xff]  ;;  %v927_v32 = vld [vmem:[%s1324_s2 + $0x8] sm:$0xff] }
 0x188   :  { %677 = vmatpush2.msra.mxu1 %v617_v33  ;;  %748 = vmatpush2.msra.mxu0 %v619_v34  ;;  %v559_v33 = vld [vmem:[#allocation4 + $0x610] sm:$0xff]  ;;  %v1253_v34 = vshrl.u32 %v74_v20, 7 }
 0x189   :  { %678 = vmatprep.subr.mxu1 %v614_v35  ;;  %749 = vmatprep.subr.mxu0 %v616_v36  ;;  %v298_v36 = vld [vmem:[%s1327_s5] sm:$0xf] }
 0x18a   :  { %679 = vmatpush2.msra.mxu1 %v613_v37  ;;  %750 = vmatpush2.msra.mxu0 %v615_v38  ;;  %v302_v35 = vsub.s32 0, %v1253_v34  ;;  %v306_v37 = vsub.s32 1, %v1253_v34 }
 0x18b   :  { %680 = vmatprep.subr.mxu1 %v610_v39  ;;  %751 = vmatprep.subr.mxu0 %v612_v40 }
 0x18c   :  { %681 = vmatpush2.msra.mxu1 %v609_v41  ;;  %752 = vmatpush2.msra.mxu0 %v611_v42  ;;  %v303_v38 = vrot.slane %v298_v36, %v302_v35  ;;  %v307_v39 = vrot.slane %v298_v36, %v306_v37 }
 0x18d   :  { %682 = vmatprep.subr.mxu1 %v606_v43  ;;  %753 = vmatprep.subr.mxu0 %v608_v44  ;;  %v314_v44 = vsub.s32 3, %v1253_v34 }
 0x18e   :  { %683 = vmatpush2.msra.mxu1 %v605_v45  ;;  %754 = vmatpush2.msra.mxu0 %v607_v46 }
 0x18f   :  { %684 = vmatprep.subr.mxu1 %v602_v47  ;;  %755 = vmatprep.subr.mxu0 %v604_v48  ;;  %v315_v47 = vrot.slane %v298_v36, %v314_v44 }
 0x190   :  { %685 = vmatpush2.msra.mxu1 %v601_v49  ;;  %756 = vmatpush2.msra.mxu0 %v603_v50  ;;  %v310_v49 = vsub.s32 2, %v1253_v34 }
 0x191   :  { %686 = vmatprep.subr.mxu1 %v598_v51  ;;  %757 = vmatprep.subr.mxu0 %v600_v52 }
 0x192   :  { %687 = vmatpush2.msra.mxu1 %v597_v53  ;;  %758 = vmatpush2.msra.mxu0 %v599_v54  ;;  %v311_v51 = vrot.slane %v298_v36, %v310_v49 }
 0x193   :  { %688 = vmatprep.subr.mxu1 %v594_v55  ;;  %759 = vmatprep.subr.mxu0 %v596_v56 }
 0x194   :  { %689 = vmatpush2.msra.mxu1 %v593_v57  ;;  %760 = vmatpush2.msra.mxu0 %v595_v58 }
 0x195   :  { %690 = vmatprep.subr.mxu1 %v590_v59  ;;  %761 = vmatprep.subr.mxu0 %v592_v60  ;;  %v169_v60 = vld [vmem:[%s1325_s3] sm:$0xff] }
 0x196   :  { %691 = vmatpush2.msra.mxu1 %v589_v61  ;;  %762 = vmatpush2.msra.mxu0 %v591_v62 }
 0x197   :  { %692 = vmatprep.subr.mxu1 %v586_v63  ;;  %763 = vmatprep.subr.mxu0 %v588_v0 }
 0x198   :  { %693 = vmatpush2.msra.mxu1 %v585_v2  ;;  %764 = vmatpush2.msra.mxu0 %v587_v3 }
 0x199   :  { %694 = vmatprep.subr.mxu1 %v582_v4  ;;  %765 = vmatprep.subr.mxu0 %v584_v5 }
 0x19a   :  { %695 = vmatpush2.msra.mxu1 %v581_v6  ;;  %766 = vmatpush2.msra.mxu0 %v583_v7  ;;  %v829_v7 = vld [vmem:[#allocation6 + $0x78] sm:$0xff] }
 0x19b   :  { %696 = vmatprep.subr.mxu1 %v578_v8  ;;  %767 = vmatprep.subr.mxu0 %v580_v9  ;;  %v828_v8 = vld [vmem:[#allocation6 + $0x70] sm:$0xff]  ;;  %v827_v9 = vld [vmem:[#allocation6 + $0x68] sm:$0xff] }
 0x19c   :  { %697 = vmatpush2.msra.mxu1 %v577_v10  ;;  %768 = vmatpush2.msra.mxu0 %v579_v11  ;;  %v826_v10 = vld [vmem:[#allocation6 + $0x60] sm:$0xff]  ;;  %v825_v11 = vld [vmem:[#allocation6 + $0x58] sm:$0xff] }
 0x19d   :  { %698 = vmatprep.subr.mxu1 %v574_v12  ;;  %769 = vmatprep.subr.mxu0 %v576_v13  ;;  %v824_v12 = vld [vmem:[#allocation6 + $0x50] sm:$0xff]  ;;  %v823_v13 = vld [vmem:[#allocation6 + $0x48] sm:$0xff] }
 0x19e   :  { %699 = vmatpush2.msra.mxu1 %v573_v14  ;;  %770 = vmatpush2.msra.mxu0 %v575_v15  ;;  %v822_v14 = vld [vmem:[#allocation6 + $0x40] sm:$0xff]  ;;  %v821_v15 = vld [vmem:[#allocation6 + $0x38] sm:$0xff] }
 0x19f   :  { %700 = vmatprep.subr.mxu1 %v570_v16  ;;  %771 = vmatprep.subr.mxu0 %v572_v17  ;;  %v820_v16 = vld [vmem:[#allocation6 + $0x30] sm:$0xff]  ;;  %v819_v17 = vld [vmem:[#allocation6 + $0x28] sm:$0xff] }
 0x1a0   :  { %701 = vmatpush2.msra.mxu1 %v569_v18  ;;  %772 = vmatpush2.msra.mxu0 %v571_v19  ;;  %v818_v18 = vld [vmem:[#allocation6 + $0x20] sm:$0xff]  ;;  %v817_v19 = vld [vmem:[#allocation6 + $0x18] sm:$0xff] }
 0x1a1   :  { %702 = vmatprep.subr.mxu1 %v566_v21  ;;  %773 = vmatprep.subr.mxu0 %v568_v22  ;;  %v816_v21 = vld [vmem:[#allocation6 + $0x10] sm:$0xff]  ;;  %v815_v22 = vld [vmem:[#allocation6 + $0x8] sm:$0xff] }
 0x1a2   :  { %703 = vmatpush2.msra.mxu1 %v565_v23  ;;  %774 = vmatpush2.msra.mxu0 %v567_v24  ;;  %v814_v23 = vld [vmem:[#allocation6] sm:$0xff] }
 0x1a3   :  { %704 = vmatprep.subr.mxu1 %v562_v25  ;;  %775 = vmatprep.subr.mxu0 %v564_v26  ;;  %v929_v24 = vld [vmem:[%s1327_s5 + $0x4] sm:$0xf] }
 0x1a4   :  { %705 = vmatpush2.msra.mxu1 %v561_v27  ;;  %776 = vmatpush2.msra.mxu0 %v563_v28  ;;  %v627_v25 = vrot.slane %v929_v24, %v302_v35  ;;  %v631_v26 = vrot.slane %v929_v24, %v306_v37  ;;  %v635_v35 = vrot.slane %v929_v24, %v310_v49 }
 0x1a5   :  { %706 = vmatprep.subr.mxu1 %v558_v29  ;;  %777 = vmatprep.subr.mxu0 %v560_v30 }
 0x1a6   :  { %707 = vmatpush2.msra.mxu1 %v557_v31  ;;  %708 = vmatprep.mubr.f32.mxu1 %v927_v32 }
 0x1a7   :  { %778 = vmatpush2.msra.mxu0 %v559_v33  ;;  %779 = vmatprep.mubr.f32.mxu0 %v927_v32 }
 0x1a8   :  { %1005 = vmatprep.subr.mxu1 %v1156_v1 }
 0x227   :  { %v386_v40 = vpop.f32.mrf.mxu1  ;;  %v457_v45 = vpop.f32.mrf.mxu0 }
 0x228   :  { %v387_v41 = vadd.f32 %v386_v40, %v303_v38  ;;  %v458_v54 = vadd.f32 %v457_v45, %v311_v51 }
 0x229   :  { %v388_v42 = vpop.f32.mrf.mxu1  ;;  %v459_v48 = vpop.f32.mrf.mxu0 }
 0x22a   :  { %v924_v43 = vmul.f32 -1.442695, %v387_v41  ;;  %v389_v20 = vadd.f32 %v388_v42, %v307_v39  ;;  %v460_v50 = vadd.f32 %v459_v48, %v315_v47 }
 0x22c   :  { %1052 = vpow2.f32 %v924_v43  ;;  %v925_v46 = vmul.f32 -1.442695, %v389_v20  ;;  %v926_v52 = vmul.f32 -1.442695, %v460_v50 }
 0x22e   :  { %1054 = vpow2.f32 %v925_v46 }
 0x22f   :  { %1056 = vpow2.f32 %v926_v52 }
 0x239   :  { %v1053_v53 = vpop.eup %1052 }
 0x23a   :  { %v465_v55 = vadd.f32 1.0, %v1053_v53 }
 0x23b   :  { %v1055_v56 = vpop.eup %1054 }
 0x23c   :  { %1058 = vrcp.f32 %v465_v55  ;;  %v471_v57 = vadd.f32 1.0, %v1055_v56  ;;  %v1057_v58 = vpop.eup %1056 }
 0x23d   :  { %1060 = vtanh.f32 %v458_v54  ;;  %v478_v63 = vadd.f32 1.0, %v1057_v58  ;;  %v935_v54 = vld [vmem:[%s1329_s7] ss:$0 sm:$0xff] }
 0x23e   :  { %1062 = vrcp.f32 %v471_v57 }
 0x23f   :  { %1064 = vrcp.f32 %v478_v63 }
 0x249   :  { %v1059_v59 = vpop.eup %1058 }
 0x24a   :  { %v1061_v61 = vpop.eup %1060 }
 0x24b   :  { %v1063_v62 = vpop.eup %1062  ;;  %v482_v0 = vmul.f32 %v1061_v61, %v1059_v59 }
 0x24c   :  { %v481_v2 = vmul.f32 %v1063_v62, %v169_v60  ;;  %v1065_v4 = vpop.eup %1064 }
 0x24e   :  { %v483_v3 = vadd.f32 %v482_v0, %v481_v2 }
 0x250   :  { %487 = vst [vmem:[%s1332_s10] sm:$0xff] %v483_v3  ;;  %1066 = vtanh.f32 %v483_v3 }
 0x25d   :  { %v1067_v5 = vpop.eup %1066 }
 0x25e   :  { %v485_v6 = vmul.f32 %v1067_v5, %v1065_v4 }
 0x260   :  { %486 = vst [vmem:[%s1331_s9] sm:$0xff] %v485_v6  ;;  %709 = vmatmul.mubr.f32.vlgmr.msra.gmra.mxu1 %v485_v6  ;;  %780 = vmatmul.mubr.f32.vlgmr.msra.gmra.mxu0 %v485_v6 }
 0x261   :  { %1037 = vmatprep.mubr.msk.f32.mxu1 %vm1157_vm0, %v1156_v1  ;;  %1006 = vmatpush3.msra.mxu1 %v829_v7 }
 0x262   :  { %1007 = vmatprep.subr.mxu1 %v1156_v1 }
 0x263   :  { %1008 = vmatpush3.msra.mxu1 %v828_v8 }
 0x264   :  { %1009 = vmatprep.subr.mxu1 %v1156_v1 }
 0x265   :  { %1010 = vmatpush3.msra.mxu1 %v827_v9 }
 0x266   :  { %1011 = vmatprep.subr.mxu1 %v1156_v1 }
 0x267   :  { %1012 = vmatpush3.msra.mxu1 %v826_v10 }
 0x268   :  { %1013 = vmatprep.subr.mxu1 %v1156_v1 }
 0x269   :  { %1014 = vmatpush3.msra.mxu1 %v825_v11 }
 0x26a   :  { %1015 = vmatprep.subr.mxu1 %v1156_v1 }
 0x26b   :  { %1016 = vmatpush3.msra.mxu1 %v824_v12 }
 0x26c   :  { %1017 = vmatprep.subr.mxu1 %v1156_v1 }
 0x26d   :  { %1018 = vmatpush3.msra.mxu1 %v823_v13 }
 0x26e   :  { %1019 = vmatprep.subr.mxu1 %v1156_v1 }
 0x26f   :  { %1020 = vmatpush3.msra.mxu1 %v822_v14 }
 0x270   :  { %1021 = vmatprep.subr.mxu1 %v1156_v1 }
 0x271   :  { %1022 = vmatpush3.msra.mxu1 %v821_v15 }
 0x272   :  { %1023 = vmatprep.subr.mxu1 %v1156_v1 }
 0x273   :  { %1024 = vmatpush3.msra.mxu1 %v820_v16 }
 0x274   :  { %1025 = vmatprep.subr.mxu1 %v1156_v1 }
 0x275   :  { %1026 = vmatpush3.msra.mxu1 %v819_v17 }
 0x276   :  { %1027 = vmatprep.subr.mxu1 %v1156_v1 }
 0x277   :  { %1028 = vmatpush3.msra.mxu1 %v818_v18 }
 0x278   :  { %1029 = vmatprep.subr.mxu1 %v1156_v1 }
 0x279   :  { %1030 = vmatpush3.msra.mxu1 %v817_v19 }
 0x27a   :  { %1031 = vmatprep.subr.mxu1 %v1156_v1 }
 0x27b   :  { %1032 = vmatpush3.msra.mxu1 %v816_v21 }
 0x27c   :  { %1033 = vmatprep.subr.mxu1 %v1156_v1 }
 0x27d   :  { %1034 = vmatpush3.msra.mxu1 %v815_v22 }
 0x27e   :  { %1035 = vmatprep.subr.mxu1 %v1156_v1  ;;  %v639_v1 = vrot.slane %v929_v24, %v314_v44  ;;  %v928_v44 = vld [vmem:[%s1325_s3 + $0x8] sm:$0xff] }
 0x27f   :  { %1036 = vmatpush3.msra.mxu1 %v814_v23 }
 0x320   :  { %v710_v27 = vpop.f32.mrf.mxu1  ;;  %v781_v32 = vpop.f32.mrf.mxu0 }
 0x321   :  { %v711_v28 = vadd.f32 %v710_v27, %v627_v25  ;;  %v782_v37 = vadd.f32 %v781_v32, %v635_v35 }
 0x322   :  { %v712_v29 = vpop.f32.mrf.mxu1  ;;  %v783_v36 = vpop.f32.mrf.mxu0 }
 0x323   :  { %v930_v30 = vmul.f32 -1.442695, %v711_v28  ;;  %v713_v31 = vadd.f32 %v712_v29, %v631_v26  ;;  %v784_v38 = vadd.f32 %v783_v36, %v639_v1 }
 0x325   :  { %1068 = vpow2.f32 %v930_v30  ;;  %v931_v33 = vmul.f32 -1.442695, %v713_v31  ;;  %v932_v39 = vmul.f32 -1.442695, %v784_v38 }
 0x327   :  { %1070 = vpow2.f32 %v931_v33 }
 0x328   :  { %1072 = vpow2.f32 %v932_v39 }
 0x332   :  { %v1069_v40 = vpop.eup %1068 }
 0x333   :  { %v789_v41 = vadd.f32 1.0, %v1069_v40 }
 0x334   :  { %v1071_v42 = vpop.eup %1070 }
 0x335   :  { %1074 = vrcp.f32 %v789_v41  ;;  %v795_v43 = vadd.f32 1.0, %v1071_v42  ;;  %v1073_v20 = vpop.eup %1072 }
 0x336   :  { %1076 = vtanh.f32 %v782_v37  ;;  %v802_v34 = vadd.f32 1.0, %v1073_v20 }
 0x337   :  { %1078 = vrcp.f32 %v795_v43 }
 0x338   :  { %1080 = vrcp.f32 %v802_v34 }
 0x342   :  { %v1075_v45 = vpop.eup %1074 }
 0x343   :  { %v1077_v46 = vpop.eup %1076 }
 0x344   :  { %v1079_v47 = vpop.eup %1078  ;;  %v806_v48 = vmul.f32 %v1077_v46, %v1075_v45 }
 0x345   :  { %v805_v49 = vmul.f32 %v1079_v47, %v928_v44  ;;  %v1081_v51 = vpop.eup %1080 }
 0x347   :  { %v807_v50 = vadd.f32 %v806_v48, %v805_v49 }
 0x349   :  { %934 = vst [vmem:[%s1332_s10 + $0x8] sm:$0xff] %v807_v50  ;;  %1082 = vtanh.f32 %v807_v50 }
 0x356   :  { %v1083_v52 = vpop.eup %1082 }
 0x357   :  { %v809_v53 = vmul.f32 %v1083_v52, %v1081_v51 }
 0x359   :  { %933 = vst [vmem:[%s1331_s9 + $0x8] sm:$0xff] %v809_v53  ;;  %1038 = vmatmul.mubr.f32.vlgmr.msra.gmra.mxu1 %v809_v53 }
 0x419   :  { %v903_v55 = vpop.f32.mrf.mxu1 }
 0x41a   :  { %v904_v56 = vadd.f32 %v935_v54, %v903_v55 }
 0x41b   :  { %v1039_v57 = vpop.f32.mrf.mxu1 }
 0x41c   :  { %907 = vst [vmem:[%s1330_s8] sm:$0xff] %v904_v56 }
 0x41d   :  { %920 = vsyncpa [#allocation3], 1 }
 0x41e   :  { %921 = vsyncpa [#allocation5], 1 }

</bundles_post_ra>
